<compile_context>
chip_gen: v7x
topology: tpu7x:2x2x1
jax: 0.10.0
libtpu: 0.0.40
codegen_flags: <defaults>
</compile_context>

<pallas_src>
import math
from functools import partial

import numpy as np
import jax
import jax.numpy as jnp
from jax import lax
from jax.experimental import pallas as pl
from jax.experimental.pallas import tpu as pltpu


# Tap order t = ky*3 + kx, offsets (dy, dx) = (ky-1, kx-1).
_OFFSETS = tuple((ky - 1, kx - 1) for ky in range(3) for kx in range(3))


def _patch_embed_kernel(x_ref, w_ref, m_ref, o_ref, *, H, W, compute_dtype,
                        has_bias):
    """3x3 conv (stride 1, pad 1) as ONE packed matmul per grid step.

    x_ref: (NB, C_in, H*W)        channel-leading, spatial flattened to lanes
    w_ref: (C_out, 9*C_in [+1])   tap-major packed weights [+ bias column]
    m_ref: (9, 1, H*W)            f32 0/1 border-validity masks per tap
    o_ref: (NB, C_out, H*W)
    """
    NB = x_ref.shape[0]
    HW = H * W

    # Hoisted once per grid step (not per image, not per tap).
    w = w_ref[...].astype(compute_dtype)          # (C_out, K)
    m = m_ref[...]                                 # (9, 1, HW), f32

    cols = []
    for n in range(NB):                            # small static unroll
        xn = x_ref[n].astype(jnp.float32)          # elementwise stays f32
        parts = []
        for t, (dy, dx) in enumerate(_OFFSETS):
            if dy == 0 and dx == 0:
                parts.append(xn)                   # center tap: mask == 1
            else:
                s = dy * W + dx                    # flat shift
                # xs[p] = xn[p + s]  (jnp.roll convention: shift = -s);
                # border mask zeroes every out-of-image (and wrap) position.
                parts.append(pltpu.roll(xn, (-s) % HW, 1) * m[t])
        cols.append(jnp.concatenate(parts, axis=0))          # (9*C_in, HW)

    # Fold the batch into the MXU N dimension (masks already zero all
    # wrap-around reads, so per-image rolls never leak across images).
    xs = cols[0] if NB == 1 else jnp.concatenate(cols, axis=1)  # (K0, NB*HW)

    if has_bias:
        # Bias folded into the matmul as a constant-ones K row.
        ones = jnp.ones((1, xs.shape[1]), xs.dtype)
        xs = jnp.concatenate([xs, ones], axis=0)

    res = jnp.dot(w, xs.astype(compute_dtype),
                  preferred_element_type=jnp.float32)         # (C_out, NB*HW)

    for n in range(NB):                                       # lane-aligned
        o_ref[n] = res[:, n * HW:(n + 1) * HW].astype(o_ref.dtype)


def _build_tap_masks(H, W):
    """f32 0/1 validity mask per tap over the flattened H*W positions."""
    HW = H * W
    h = np.arange(HW) // W
    w = np.arange(HW) % W
    masks = np.zeros((9, 1, HW), np.float32)
    for t, (dy, dx) in enumerate(_OFFSETS):
        valid = ((h + dy >= 0) & (h + dy < H)
                 & (w + dx >= 0) & (w + dx < W))
        masks[t, 0, :] = valid.astype(np.float32)
    return jnp.asarray(masks)


def _default_batch_block(n):
    """Largest divisor of n giving >= 2 grid steps (so both v7x TCs work)."""
    if n <= 1:
        return max(n, 1)
    target = max(1, n // 2)
    for d in range(target, 0, -1):
        if n % d == 0:
            return d
    return 1


def overlap_patch_embed_pallas(x_nchw, weight_oihw, bias=None, *,
                               batch_block=None,
                               compute_dtype=jnp.float32,
                               vmem_limit_bytes=None):
    """x_nchw: (N, C_in, H, W); weight_oihw: (C_out, C_in, 3, 3) (PyTorch).

    Returns (N, C_out, H, W). Set compute_dtype=jnp.bfloat16 on v6e/v7x to
    run the packed MXU matmul in bf16 (accumulation stays f32).
    """
    N, C_in, H, W = x_nchw.shape
    C_out = weight_oihw.shape[0]
    HW = H * W

    if batch_block is None:
        batch_block = _default_batch_block(N)
    assert N % batch_block == 0, "batch_block must divide N"

    # (N, C, H, W) -> (N, C, H*W): free reshape, spatial stays the lane dim.
    x = x_nchw.reshape(N, C_in, HW)

    # (C_out, C_in, ky, kx) -> (C_out, ky, kx, C_in) -> (C_out, 9*C_in)
    # so column index = t*C_in + c with t = ky*3 + kx (matches xs stacking).
    w_packed = jnp.transpose(weight_oihw, (0, 2, 3, 1)).reshape(C_out, 9 * C_in)
    has_bias = bias is not None
    if has_bias:
        w_packed = jnp.concatenate(
            [w_packed, bias.reshape(C_out, 1).astype(w_packed.dtype)], axis=1)
    K = w_packed.shape[1]

    masks = _build_tap_masks(H, W)

    kernel = partial(_patch_embed_kernel, H=H, W=W,
                     compute_dtype=compute_dtype, has_bias=has_bias)

    out = pl.pallas_call(
        kernel,
        out_shape=jax.ShapeDtypeStruct((N, C_out, HW), x_nchw.dtype),
        grid=(N // batch_block,),
        in_specs=[
            pl.BlockSpec((batch_block, C_in, HW), lambda i: (i, 0, 0)),
            pl.BlockSpec((C_out, K), lambda i: (0, 0)),
            pl.BlockSpec((9, 1, HW), lambda i: (0, 0, 0)),
        ],
        out_specs=pl.BlockSpec((batch_block, C_out, HW), lambda i: (i, 0, 0)),
        compiler_params=pltpu.CompilerParams(
            dimension_semantics=("parallel",),
            vmem_limit_bytes=vmem_limit_bytes),
    )(x, w_packed, masks)

    return out.reshape(N, C_out, H, W)


def overlap_patch_embed_reference(x, weight, bias=None):
    """Pure-JAX reference (lax conv) for verification."""
    out = lax.conv_general_dilated(
        x.astype(jnp.float32), weight.astype(jnp.float32),
        window_strides=(1, 1), padding=((1, 1), (1, 1)),
        dimension_numbers=("NCHW", "OIHW", "NCHW"))
    if bias is not None:
        out = out + bias.astype(jnp.float32)[None, :, None, None]
    return out.astype(x.dtype)


if __name__ == "__main__":
    key = jax.random.PRNGKey(0)
    k_x, k_w, k_b = jax.random.split(key, 3)

    # Module defaults: in_c=3, embed_dim=48, bias=False.  Small spatial size.
    N, in_c, H, W = 2, 3, 16, 16
    embed_dim = 48

    x = jax.random.normal(k_x, (N, in_c, H, W), jnp.float32)
    weight = jax.random.normal(k_w, (embed_dim, in_c, 3, 3), jnp.float32) * (
        1.0 / math.sqrt(in_c * 9))

    ref = overlap_patch_embed_reference(x, weight)

    # 1) Module default (bias=False); default batch_block -> 2-step parallel grid.
    out = jax.block_until_ready(overlap_patch_embed_pallas(x, weight))
    assert out.shape == (N, embed_dim, H, W)
    assert jnp.allclose(out, ref, atol=1e-4, rtol=1e-4), "mismatch (default)"

    # 2) Whole batch in one grid step (exercises the lane-axis batch fold).
    out2 = jax.block_until_ready(
        overlap_patch_embed_pallas(x, weight, batch_block=N))
    assert jnp.allclose(out2, ref, atol=1e-4, rtol=1e-4), "mismatch (batch fold)"

    # 3) bias=True variant (bias folded into the packed matmul as a K row).
    bias = jax.random.normal(k_b, (embed_dim,), jnp.float32)
    ref_b = overlap_patch_embed_reference(x, weight, bias)
    out3 = jax.block_until_ready(
        overlap_patch_embed_pallas(x, weight, bias))
    assert jnp.allclose(out3, ref_b, atol=1e-4, rtol=1e-4), "mismatch (bias)"

    # 4) bf16 MXU-operand path (v6e/v7x production default), looser tolerance.
    out4 = jax.block_until_ready(
        overlap_patch_embed_pallas(x, weight, compute_dtype=jnp.bfloat16))
    assert jnp.allclose(out4, ref, atol=1e-1, rtol=5e-2), "mismatch (bf16)"

    print("KERNEL_OK")
</pallas_src>

<mosaic_0001>
module attributes {stable_mosaic.version = 11 : i64} {
  func.func @_patch_embed_kernel(%arg0: i32, %arg1: memref<1x3x256xf32, #tpu.memory_space<vmem>>, %arg2: memref<48x27xf32, #tpu.memory_space<vmem>>, %arg3: memref<9x1x256xf32, #tpu.memory_space<vmem>>, %arg4: memref<1x48x256xf32, #tpu.memory_space<vmem>>) attributes {dimension_semantics = [#tpu.dimension_semantics<parallel>], iteration_bounds = array<i64: 2>, scalar_prefetch = 0 : i64, scratch_operands = 0 : i64, tpu.core_type = #tpu.core_type<tc>, window_params = [{transform_indices = @transform_0, window_bounds = array<i64: 1, 3, 256>}, {pipeline_mode = #tpu.pipeline_mode<synchronous>, transform_indices = @transform_1, window_bounds = array<i64: 48, 27>}, {pipeline_mode = #tpu.pipeline_mode<synchronous>, transform_indices = @transform_2, window_bounds = array<i64: 9, 1, 256>}, {transform_indices = @transform_3, window_bounds = array<i64: 1, 48, 256>}]} {
    %c0 = arith.constant 0 : index
    %c0_0 = arith.constant 0 : index
    %0 = vector.load %arg2[%c0, %c0_0] : memref<48x27xf32, #tpu.memory_space<vmem>>, vector<48x27xf32>
    %c0_1 = arith.constant 0 : index
    %c0_2 = arith.constant 0 : index
    %c0_3 = arith.constant 0 : index
    %1 = vector.load %arg3[%c0_1, %c0_2, %c0_3] : memref<9x1x256xf32, #tpu.memory_space<vmem>>, vector<9x1x256xf32>
    %c0_4 = arith.constant 0 : index
    %c0_5 = arith.constant 0 : index
    %c0_6 = arith.constant 0 : index
    %2 = vector.load %arg1[%c0_4, %c0_5, %c0_6] : memref<1x3x256xf32, #tpu.memory_space<vmem>>, vector<1x3x256xf32>
    %3 = vector.shape_cast %2 : vector<1x3x256xf32> to vector<3x256xf32>
    %c17_i32 = arith.constant 17 : i32
    %4 = tpu.dynamic_rotate %3 by %c17_i32 dim 1 : vector<3x256xf32>, i32 -> vector<3x256xf32>
    %5 = vector.extract_strided_slice %1 {offsets = [0, 0, 0], sizes = [1, 1, 256], strides = [1, 1, 1]} : vector<9x1x256xf32> to vector<1x1x256xf32>
    %6 = vector.shape_cast %5 : vector<1x1x256xf32> to vector<1x256xf32>
    %7 = vector.broadcast %6 : vector<1x256xf32> to vector<3x256xf32>
    %8 = arith.mulf %4, %7 : vector<3x256xf32>
    %c16_i32 = arith.constant 16 : i32
    %9 = tpu.dynamic_rotate %3 by %c16_i32 dim 1 : vector<3x256xf32>, i32 -> vector<3x256xf32>
    %10 = vector.extract_strided_slice %1 {offsets = [1, 0, 0], sizes = [1, 1, 256], strides = [1, 1, 1]} : vector<9x1x256xf32> to vector<1x1x256xf32>
    %11 = vector.shape_cast %10 : vector<1x1x256xf32> to vector<1x256xf32>
    %12 = vector.broadcast %11 : vector<1x256xf32> to vector<3x256xf32>
    %13 = arith.mulf %9, %12 : vector<3x256xf32>
    %c15_i32 = arith.constant 15 : i32
    %14 = tpu.dynamic_rotate %3 by %c15_i32 dim 1 : vector<3x256xf32>, i32 -> vector<3x256xf32>
    %15 = vector.extract_strided_slice %1 {offsets = [2, 0, 0], sizes = [1, 1, 256], strides = [1, 1, 1]} : vector<9x1x256xf32> to vector<1x1x256xf32>
    %16 = vector.shape_cast %15 : vector<1x1x256xf32> to vector<1x256xf32>
    %17 = vector.broadcast %16 : vector<1x256xf32> to vector<3x256xf32>
    %18 = arith.mulf %14, %17 : vector<3x256xf32>
    %c1_i32 = arith.constant 1 : i32
    %19 = tpu.dynamic_rotate %3 by %c1_i32 dim 1 : vector<3x256xf32>, i32 -> vector<3x256xf32>
    %20 = vector.extract_strided_slice %1 {offsets = [3, 0, 0], sizes = [1, 1, 256], strides = [1, 1, 1]} : vector<9x1x256xf32> to vector<1x1x256xf32>
    %21 = vector.shape_cast %20 : vector<1x1x256xf32> to vector<1x256xf32>
    %22 = vector.broadcast %21 : vector<1x256xf32> to vector<3x256xf32>
    %23 = arith.mulf %19, %22 : vector<3x256xf32>
    %c255_i32 = arith.constant 255 : i32
    %24 = tpu.dynamic_rotate %3 by %c255_i32 dim 1 : vector<3x256xf32>, i32 -> vector<3x256xf32>
    %25 = vector.extract_strided_slice %1 {offsets = [5, 0, 0], sizes = [1, 1, 256], strides = [1, 1, 1]} : vector<9x1x256xf32> to vector<1x1x256xf32>
    %26 = vector.shape_cast %25 : vector<1x1x256xf32> to vector<1x256xf32>
    %27 = vector.broadcast %26 : vector<1x256xf32> to vector<3x256xf32>
    %28 = arith.mulf %24, %27 : vector<3x256xf32>
    %c241_i32 = arith.constant 241 : i32
    %29 = tpu.dynamic_rotate %3 by %c241_i32 dim 1 : vector<3x256xf32>, i32 -> vector<3x256xf32>
    %30 = vector.extract_strided_slice %1 {offsets = [6, 0, 0], sizes = [1, 1, 256], strides = [1, 1, 1]} : vector<9x1x256xf32> to vector<1x1x256xf32>
    %31 = vector.shape_cast %30 : vector<1x1x256xf32> to vector<1x256xf32>
    %32 = vector.broadcast %31 : vector<1x256xf32> to vector<3x256xf32>
    %33 = arith.mulf %29, %32 : vector<3x256xf32>
    %c240_i32 = arith.constant 240 : i32
    %34 = tpu.dynamic_rotate %3 by %c240_i32 dim 1 : vector<3x256xf32>, i32 -> vector<3x256xf32>
    %35 = vector.extract_strided_slice %1 {offsets = [7, 0, 0], sizes = [1, 1, 256], strides = [1, 1, 1]} : vector<9x1x256xf32> to vector<1x1x256xf32>
    %36 = vector.shape_cast %35 : vector<1x1x256xf32> to vector<1x256xf32>
    %37 = vector.broadcast %36 : vector<1x256xf32> to vector<3x256xf32>
    %38 = arith.mulf %34, %37 : vector<3x256xf32>
    %c239_i32 = arith.constant 239 : i32
    %39 = tpu.dynamic_rotate %3 by %c239_i32 dim 1 : vector<3x256xf32>, i32 -> vector<3x256xf32>
    %40 = vector.extract_strided_slice %1 {offsets = [8, 0, 0], sizes = [1, 1, 256], strides = [1, 1, 1]} : vector<9x1x256xf32> to vector<1x1x256xf32>
    %41 = vector.shape_cast %40 : vector<1x1x256xf32> to vector<1x256xf32>
    %42 = vector.broadcast %41 : vector<1x256xf32> to vector<3x256xf32>
    %43 = arith.mulf %39, %42 : vector<3x256xf32>
    %44 = tpu.concatenate %8, %13, %18, %23, %3, %28, %33, %38, %43 in 0 : vector<3x256xf32>, vector<3x256xf32>, vector<3x256xf32>, vector<3x256xf32>, vector<3x256xf32>, vector<3x256xf32>, vector<3x256xf32>, vector<3x256xf32>, vector<3x256xf32> -> vector<27x256xf32>
    %cst = arith.constant dense<0.000000e+00> : vector<48x256xf32>
    %45 = tpu.matmul %0, %44, %cst {dimension_numbers = #tpu.dot_dimension_numbers<[1], [0], [0], [1], [0, 0, 1, 1], [], []>} : vector<48x27xf32>, vector<27x256xf32>, vector<48x256xf32> -> vector<48x256xf32>
    %c0_7 = arith.constant 0 : index
    %c0_8 = arith.constant 0 : index
    %c0_9 = arith.constant 0 : index
    %46 = vector.load %arg4[%c0_7, %c0_8, %c0_9] : memref<1x48x256xf32, #tpu.memory_space<vmem>>, vector<1x48x256xf32>
    %47 = vector.shape_cast %46 : vector<1x48x256xf32> to vector<48x256xf32>
    %48 = vector.shape_cast %45 : vector<48x256xf32> to vector<1x48x256xf32>
    tpu.vector_store %arg4[%c0_7, %c0_8, %c0_9], %48 {strides = array<i32>} : memref<1x48x256xf32, #tpu.memory_space<vmem>>, vector<1x48x256xf32>,
    return
  }
  func.func @transform_0(%arg0: i32) -> (i32, i32, i32) {
    %c0_i32 = arith.constant 0 : i32
    %c0_i32_0 = arith.constant 0 : i32
    %c0_i32_1 = arith.constant 0 : i32
    return %arg0, %c0_i32, %c0_i32_0 : i32, i32, i32
  }
  func.func @transform_1(%arg0: i32) -> (i32, i32) {
    %c0_i32 = arith.constant 0 : i32
    %c0_i32_0 = arith.constant 0 : i32
    %c0_i32_1 = arith.constant 0 : i32
    return %c0_i32, %c0_i32_0 : i32, i32
  }
  func.func @transform_2(%arg0: i32) -> (i32, i32, i32) {
    %c0_i32 = arith.constant 0 : i32
    %c0_i32_0 = arith.constant 0 : i32
    %c0_i32_1 = arith.constant 0 : i32
    %c0_i32_2 = arith.constant 0 : i32
    return %c0_i32, %c0_i32_0, %c0_i32_1 : i32, i32, i32
  }
  func.func @transform_3(%arg0: i32) -> (i32, i32, i32) {
    %c0_i32 = arith.constant 0 : i32
    %c0_i32_0 = arith.constant 0 : i32
    %c0_i32_1 = arith.constant 0 : i32
    return %arg0, %c0_i32, %c0_i32_0 : i32, i32, i32
  }
}

</mosaic_0001>

<bundles_post_ra>
// kernel: tpu_custom_call.1
= control target key start
LH: loop header
LB: loop body
LE: loop exit
PB: predicated region body
PF: predicated region fallthrough
CT: control target
= control target key end

     0   :  { %8 = vsyncpa [#allocation3], 0  ;;  %s1054_s0 = inlined_call_operand.vmem [shape: f32[2,3,256], index: 0, kind: input, shape index: {}]   ;;  %s1055_s1 = inlined_call_operand.vmem [shape: f32[48,27], index: 1, kind: input, shape index: {}]   ;;  %s1056_s2 = inlined_call_operand.vmem [shape: f32[9,1,256], index: 2, kind: input, shape index: {}]   ;;  %s1057_s3 = inlined_call_operand.hbm [shape: f32[2,48,256], index: 3, kind: output, shape index: {}]  }
   0x1   :  { %10 = vsyncpa [#allocation3 + $0x1], 0  ;;  %s804_s12 = smov 0   ;;  %s806_s13 = smov 0  }
   0x2   :  { %s808_s14 = smov 0   ;;  %s810_s15 = smov 0  }
   0x3 LB: > { %s825_s16 = sadd.s32 4294967295, %s770_s15   ;;  %s622_s17 = sadd.s32 4294967294, %s770_s15   ;;  %s770_s15 = sphi %s810_s15, %s1063_s15   ;;  %s766_s14 = sphi %s808_s14, %s1062_s14   ;;  %s762_s13 = sphi %s806_s13, %s1061_s13   ;;  %s758_s12 = sphi %s804_s12, %s1060_s12  }
   0x4   : > { %s829_s18 = sadd.s32 1, %s770_s15   ;;  %s91_s19 = sadd.s32 1, %s766_s14 }
   0x5   : > { %s88_s20 = ssub.s32 %s770_s15, %s829_s18  ;;  %p101_p0 = scmp.ne.s32.totalorder %s766_s14, %s762_s13 }
   0x6   : > { %p89_p1 = scmp.eq.s32.totalorder %s88_s20, 0  ;;  %p102_p2 = scmp.eq.s32.totalorder %s825_s16, 1 }
   0x7   : > { %p107_p3 = scmp.ne.s32.totalorder %s762_s13, %s758_s12  ;;  %p108_p4 = scmp.eq.s32.totalorder %s622_s17, 1 }
   0x8   : > { %s840_s21 = scalar_select %p89_p1, %s766_s14, %s91_s19  }
   0x9   : > { %p842_p5 = por %p102_p2, %p101_p0  ;;  %p846_p6 = por %p108_p4, %p107_p3 }
   0xa   : > { %p625_p7 = scmp.ge.s32.totalorder %s770_s15, 1  ;;  %p140_p8 = scmp.lt.s32.totalorder %s770_s15, 3 }
   0xc   : > { %p141_p9 = pnand %p625_p7, %p140_p8 }
   0xd   : > { %p164_p10 = scmp.lt.s32.totalorder (!%p141_p9), %s825_s16, 1  ;;  %s772_s29 = smov (!%p141_p9), 1   ;;  %v778_v2 = vmov (!%p141_p9), 0.0   ;;  %v191_v3 = vlaneseq (!%p141_p9)  ;;  %v178_v10 = vld [vmem:[%s1056_s2 + $0x6] sm:$0x3] (!%p141_p9)  ;;  %vm393_vm4 = vcmask (!%p141_p9), 1040384  }
   0xe   : > { %144 = sbr.rel (%p141_p9) target bundleno = 414 (0x19e), region = 32  ;;  %s773_s30 = smov (!%p141_p9), 15   ;;  %497 = vmatprep.mubr.f32.mxu0 (!%p141_p9), %v778_v2  ;;  %515 = vmatprep.mubr.f32.mxu1 (!%p141_p9), %v778_v2  ;;  %v177_v11 = vld [vmem:[%s1056_s2 + $0x4] sm:$0x3] (!%p141_p9)  ;;  %v176_v14 = vld [vmem:[%s1056_s2 + $0x2] sm:$0x3] (!%p141_p9) }
   0xf   : > { %s774_s4 = smov (!%p141_p9), 16   ;;  %s775_s5 = smov (!%p141_p9), 127   ;;  %v198_v4 = vshrl.u32 (!%p141_p9), %v191_v3, 7  ;;  %v873_v5 = vand.u32 (!%p141_p9), 127, %v191_v3  ;;  %v179_v17 = vld [vmem:[%s1056_s2 + $0xa] sm:$0x3] (!%p141_p9) }
  0x10   : > { %s776_s6 = smov (!%p141_p9), 17   ;;  %s777_s7 = smov (!%p141_p9), 113   ;;  %v175_v28 = vld [vmem:[%s1056_s2] sm:$0x3] (!%p141_p9)  ;;  %vm396_vm5 = vcmask (!%p141_p9), 1043456   ;;  %vm399_vm7 = vcmask (!%p141_p9), 1046528  }
  0x11   : > { %s779_s8 = smov (!%p141_p9), 112   ;;  %s780_s9 = smov (!%p141_p9), 111   ;;  %v875_v8 = vsub.s32 (!%p141_p9), 0, %v198_v4  ;;  %v877_v9 = vsub.s32 (!%p141_p9), 1, %v198_v4  ;;  %vm253_vm0 = vcmp.lt.s32.totalorder (!%p141_p9), %v873_v5, 1  ;;  %vm233_vm1 = vcmp.lt.s32.totalorder (!%p141_p9), %v873_v5, 15 }
  0x12   : > { %vm213_vm2 = vcmp.lt.s32.totalorder (!%p141_p9), %v873_v5, 16  ;;  %vm273_vm3 = vcmp.lt.s32.totalorder (!%p141_p9), %v873_v5, 127  ;;  %vm193_vm6 = vcmp.lt.s32.totalorder (!%p141_p9), %v873_v5, 17  ;;  %v180_v44 = vld [vmem:[%s1056_s2 + $0xc] sm:$0x3] (!%p141_p9)  ;;  %vm293_vm8 = vcmp.lt.s32.totalorder (!%p141_p9), %v873_v5, 113 }
  0x13   : > { %v260_v15 = vrot.slane (!%p141_p9), %v178_v10, %v875_v8  ;;  %v264_v16 = vrot.slane (!%p141_p9), %v178_v10, %v877_v9  ;;  %v240_v20 = vrot.slane (!%p141_p9), %v177_v11, %v875_v8  ;;  %v244_v21 = vrot.slane (!%p141_p9), %v177_v11, %v877_v9  ;;  %v181_v60 = vld [vmem:[%s1056_s2 + $0xe] sm:$0x3] (!%p141_p9)  ;;  %s782_s19 = smov (!%p141_p9), [#allocation2]  }
  0x14   : > { %v220_v22 = vrot.slane (!%p141_p9), %v176_v14, %v875_v8  ;;  %v224_v23 = vrot.slane (!%p141_p9), %v176_v14, %v877_v9  ;;  %v280_v26 = vrot.slane (!%p141_p9), %v179_v17, %v875_v8  ;;  %v284_v27 = vrot.slane (!%p141_p9), %v179_v17, %v877_v9  ;;  %s712_s20 = sshll.u32 (!%p141_p9), %s782_s19, 4  ;;  %s713_s20 = int_to_ptr.vmem [resolvable:$false] %s712_s20 }
  0x15   : > { %s165_s24 = scalar_select %p164_p10, %s825_s16, 1  ;;  %v200_v38 = vrot.slane %v175_v28, %v875_v8  ;;  %v204_v43 = vrot.slane %v175_v28, %v877_v9  ;;  %v300_v53 = vrot.slane %v180_v44, %v875_v8  ;;  %v304_v54 = vrot.slane %v180_v44, %v877_v9 }
  0x16   : > { %vm387_vm9 = vcmask 1042432   ;;  %vm390_vm10 = vcmask 1045504   ;;  %vm313_vm11 = vcmp.lt.s32.totalorder %v873_v5, 112  ;;  %v320_v10 = vrot.slane %v181_v60, %v875_v8 }
  0x17   : > { %s639_s25 = sshll.u32 %s165_s24, 3  ;;  %v324_v11 = vrot.slane %v181_v60, %v877_v9  ;;  %vm402_vm12 = vcmask 1041408   ;;  %vm333_vm13 = vcmp.lt.s32.totalorder %v873_v5, 111  ;;  %vm405_vm14 = vcmask 1044480   ;;  %v172_v5 = vld [vmem:[%s1055_s1 + $0x18] sm:$0xff]  ;;  %s714_s24 = scalar_lea.vmem %s713_s20, 3072 }
  0x18   : > { %s168_s28 = scalar_lea.vmem %s1054_s0, %s639_s25  ;;  %vm781_vm15 = vmmov 1  }
  0x19   : > { %v857_v0 = vld [vmem:[%s168_s28] sm:$0x77] }
  0x1a   : > { %249 = vrot.lane.b32.xlu1 %v857_v0, %s772_s29  ;;  %229 = vrot.lane.b32.xlu0 %v857_v0, %s773_s30  ;;  %v185_v1 = vcombine.high %v857_v0, %v857_v0  ;;  %v367_v35 = vcombine.low %v857_v0, %v857_v0 }
  0x1e   : > { %209 = vrot.lane.b32.xlu0 %v857_v0, %s774_s4  ;;  %251 = vrot.lane.b32.xlu1 %v185_v1, %s772_s29 }
  0x22   : > { %211 = vrot.lane.b32.xlu1 %v185_v1, %s774_s4  ;;  %231 = vrot.lane.b32.xlu0 %v185_v1, %s773_s30  ;;  %s161_s30 = sand.u32 1, %s762_s13  }
  0x26   : > { %271 = vrot.lane.b32.xlu1 %v185_v1, %s775_s5  ;;  %269 = vrot.lane.b32.xlu0 %v857_v0, %s775_s5  ;;  %s654_s5 = smul.u32 96, %s161_s30 }
  0x2a   : > { %189 = vrot.lane.b32.xlu1 %v185_v1, %s776_s6  ;;  %187 = vrot.lane.b32.xlu0 %v857_v0, %s776_s6  ;;  %s163_s6 = scalar_lea.vmem [#allocation2], %s654_s5 }
  0x2e   : > { %291 = vrot.lane.b32.xlu1 %v185_v1, %s777_s7  ;;  %289 = vrot.lane.b32.xlu0 %v857_v0, %s777_s7  ;;  %s655_s7 = smul.u32 1536, %s825_s16  ;;  %s1012_s16 = scalar_lea.sflag [#allocation3], %s161_s30 }
  0x30   : > { %s1006_s11 = scalar_lea.hbm %s1057_s3, %s655_s7 }
  0x32   : > { %311 = vrot.lane.b32.xlu1 %v185_v1, %s779_s8  ;;  %309 = vrot.lane.b32.xlu0 %v857_v0, %s779_s8  ;;  %s560_s8 = sshll.u32 %s163_s6, 4  ;;  %s1008_s8 = int_to_ptr.vmem [resolvable:$true] %s560_s8 }
  0x33   : > { %s708_s17 = scalar_lea.vmem %s1008_s8, 1536  ;;  %p715_p0 = scmp.lt.s32.totalorder %s1008_s8, %s713_s20 }
  0x34   : > { %p709_p11 = scmp.ne.s32.totalorder %s1008_s8, %s708_s17  ;;  %p716_p1 = scmp.lt.s32.totalorder %s714_s24, %s708_s17 }
  0x36   : > { %331 = vrot.lane.b32.xlu1 %v185_v1, %s780_s9  ;;  %329 = vrot.lane.b32.xlu0 %v857_v0, %s780_s9  ;;  %p710_p12 = pnand %p709_p11, %p842_p5  ;;  %p717_p2 = por %p716_p1, %p715_p0 }
  0x38   : > { %p711_p13 = pneg %p710_p12 }
  0x3a   : > { %p718_p3 = pnand %p717_p2, %p711_p13 }
  0x8c   : > { %v250_v6 = vpop.permute.xlu1 %249  ;;  %v230_v7 = vpop.permute.xlu0 %229 }
  0x90   : > { %v210_v12 = vpop.permute.xlu0 %209  ;;  %v252_v13 = vpop.permute.xlu1 %251 }
  0x91   : > { %v254_v18 = vsel %vm253_vm0, %v250_v6, %v252_v13  ;;  %v255_v19 = vsel %vm253_vm0, %v252_v13, %v250_v6  ;;  %vm645_vm0 = vmpackc.low %vm387_vm9, %vm781_vm15 }
  0x92   : > { %v267_v29 = vmul.f32 %v260_v15, %v255_v19  ;;  %v268_v30 = vmul.f32 %v264_v16, %v254_v18 }
  0x94   : > { %v212_v24 = vpop.permute.xlu1 %211  ;;  %v232_v25 = vpop.permute.xlu0 %231  ;;  %v363_v45 = vrot.slane %v267_v29, 7  ;;  %v364_v46 = vrot.slane %v268_v30, 7 }
  0x95   : > { %v234_v31 = vsel %vm233_vm1, %v230_v7, %v232_v25  ;;  %v235_v32 = vsel %vm233_vm1, %v232_v25, %v230_v7  ;;  %v214_v36 = vsel %vm213_vm2, %v210_v12, %v212_v24  ;;  %v215_v37 = vsel %vm213_vm2, %v212_v24, %v210_v12 }
  0x96   : > { %v247_v33 = vmul.f32 %v240_v20, %v235_v32  ;;  %v248_v34 = vmul.f32 %v244_v21, %v234_v31  ;;  %v227_v49 = vmul.f32 %v220_v22, %v215_v37  ;;  %v228_v50 = vmul.f32 %v224_v23, %v214_v36 }
  0x97   : > { %vm408_vm1 = vcmask 220160  }
  0x98   : > { %v357_v39 = vrot.slane %v247_v33, 2  ;;  %v358_v40 = vrot.slane %v248_v34, 2  ;;  %v272_v41 = vpop.permute.xlu1 %271  ;;  %v270_v42 = vpop.permute.xlu0 %269  ;;  %v351_v1 = vrot.slane %v227_v49, 5  ;;  %v352_v3 = vrot.slane %v228_v50, 5  ;;  %v169_v49 = vld [vmem:[%s1055_s1] sm:$0xff]  ;;  %v170_v50 = vld [vmem:[%s1055_s1 + $0x8] sm:$0xff] }
  0x99   : > { %v274_v47 = vsel %vm273_vm3, %v270_v42, %v272_v41  ;;  %v275_v48 = vsel %vm273_vm3, %v272_v41, %v270_v42 }
  0x9a   : > { %v926_v51 = vmul.f32 %v280_v26, %v274_v47  ;;  %v928_v52 = vmul.f32 %v284_v27, %v275_v48  ;;  %v395_v59 = vsel %vm393_vm4, %v358_v40, %v364_v46  ;;  %v394_v61 = vsel %vm393_vm4, %v357_v39, %v363_v45  ;;  %v182_v26 = vld [vmem:[%s1056_s2 + $0x10] sm:$0x3] }
  0x9b   : > { %v398_v7 = vsel %vm396_vm5, %v395_v59, %v857_v0  ;;  %v397_v12 = vsel %vm396_vm5, %v394_v61, %v367_v35  ;;  %v340_v35 = vrot.slane %v182_v26, %v875_v8  ;;  %v344_v36 = vrot.slane %v182_v26, %v877_v9 }
  0x9c   : > { %v371_v55 = vrot.slane %v926_v51, 1  ;;  %v372_v56 = vrot.slane %v928_v52, 1  ;;  %v190_v57 = vpop.permute.xlu1 %189  ;;  %v188_v58 = vpop.permute.xlu0 %187  ;;  %v173_v51 = vld [vmem:[%s1055_s1 + $0x20] sm:$0xff]  ;;  %v171_v52 = vld [vmem:[%s1055_s1 + $0x10] sm:$0xff] }
  0x9d   : > { %v194_v62 = vsel %vm193_vm6, %v188_v58, %v190_v57  ;;  %v195_v63 = vsel %vm193_vm6, %v190_v57, %v188_v58 }
  0x9e   : > { %v207_v4 = vmul.f32 %v200_v38, %v195_v63  ;;  %v208_v6 = vmul.f32 %v204_v43, %v194_v62  ;;  %v401_v16 = vsel %vm399_vm7, %v398_v7, %v372_v56  ;;  %v400_v18 = vsel %vm399_vm7, %v397_v12, %v371_v55 }
  0xa0   : > { %v292_v13 = vpop.permute.xlu1 %291  ;;  %v290_v14 = vpop.permute.xlu0 %289  ;;  %v389_v15 = vsel %vm387_vm9, %v208_v6, %v352_v3  ;;  %v388_v17 = vsel %vm387_vm9, %v207_v4, %v351_v1 }
  0xa1   : > { %v294_v19 = vsel %vm293_vm8, %v290_v14, %v292_v13  ;;  %v295_v0 = vsel %vm293_vm8, %v292_v13, %v290_v14  ;;  %v392_v20 = vsel %vm390_vm10, %v389_v15, %v358_v40  ;;  %v391_v21 = vsel %vm390_vm10, %v388_v17, %v357_v39 }
  0xa2   : > { %v307_v22 = vmul.f32 %v300_v53, %v294_v19  ;;  %v308_v23 = vmul.f32 %v304_v54, %v295_v0  ;;  %v640_v24 = vpack.c.bf16 %v401_v16, %v392_v20  ;;  %v642_v25 = vpack.c.bf16 %v400_v18, %v391_v21  ;;  %v174_v53 = vld [vmem:[%s1055_s1 + $0x28] sm:$0xff] }
  0xa4   : > { %v312_v27 = vpop.permute.xlu1 %311  ;;  %641 = vmatprep.subr.bf16.mxu0 %v640_v24  ;;  %650 = vmatprep.subr.bf16.mxu1 %v640_v24  ;;  %v310_v28 = vpop.permute.xlu0 %309  ;;  %v377_v29 = vrot.slane %v307_v22, 6  ;;  %v378_v30 = vrot.slane %v308_v23, 6 }
  0xa5   : > { %v314_v31 = vsel %vm313_vm11, %v310_v28, %v312_v27  ;;  %v315_v32 = vsel %vm313_vm11, %v312_v27, %v310_v28  ;;  %643 = vmatpush1.bf16.msra.mxu0 %v642_v25  ;;  %652 = vmatpush1.bf16.msra.mxu1 %v642_v25 }
  0xa6   : > { %v327_v33 = vmul.f32 %v320_v10, %v314_v31  ;;  %v328_v34 = vmul.f32 %v324_v11, %v315_v32  ;;  %v403_v41 = vsel %vm402_vm12, %v371_v55, %v377_v29  ;;  %v404_v42 = vsel %vm402_vm12, %v372_v56, %v378_v30 }
  0xa8   : > { %v383_v37 = vrot.slane %v327_v33, 3  ;;  %v384_v38 = vrot.slane %v328_v34, 3  ;;  %v332_v39 = vpop.permute.xlu1 %331  ;;  %v330_v40 = vpop.permute.xlu0 %329 }
  0xa9   : > { %v334_v43 = vsel %vm333_vm13, %v330_v40, %v332_v39  ;;  %v335_v44 = vsel %vm333_vm13, %v332_v39, %v330_v40 }
  0xaa   : > { %v406_v45 = vsel %vm405_vm14, %v403_v41, %v383_v37  ;;  %v407_v46 = vsel %vm405_vm14, %v404_v42, %v384_v38  ;;  %v347_v8 = vmul.f32 %v340_v35, %v334_v43  ;;  %v348_v47 = vmul.f32 %v344_v36, %v335_v44 }
  0xac   : > { %v644_v9 = vpack.c.bf16 %v348_v47, %v407_v46  ;;  %v647_v48 = vpack.c.bf16 %v347_v8, %v406_v45 }
  0xae   : > { %646 = vmatprep.subr.msk.bf16.mxu0 %vm645_vm0, %v644_v9  ;;  %651 = vmatprep.subr.msk.bf16.mxu1 %vm645_vm0, %v644_v9 }
  0xaf   : > { %649 = vmatpush1.bf16.msk.msra.mxu0 %vm645_vm0, %v647_v48  ;;  %653 = vmatpush1.bf16.msk.msra.mxu1 %vm645_vm0, %v647_v48 }
  0xb2   : > { %630 = vmatmul.mubr.msk.f32.vlgmr.msra.gmra.mrb[0].mxu0 %vm408_vm1, %v169_v49  ;;  %633 = vmatmul.mubr.msk.f32.vlgmr.msra.gmra.mrb[0].mxu1 %vm408_vm1, %v172_v5 }
  0xb3   : > { %503 = vmatprep.mubr.f32.mxu0 %v778_v2  ;;  %521 = vmatprep.mubr.f32.mxu1 %v778_v2 }
  0xb6   : > { %631 = vmatmul.mubr.msk.f32.gmra.mrb[2].mxu0 %vm408_vm1, %v170_v50  ;;  %634 = vmatmul.mubr.msk.f32.gmra.mrb[2].mxu1 %vm408_vm1, %v173_v51 }
  0xb7   : > { %509 = vmatprep.mubr.f32.mxu0 %v778_v2  ;;  %527 = vmatprep.mubr.f32.mxu1 %v778_v2 }
  0xba   : > { %632 = vmatmul.mubr.msk.f32.gmra.mrb[4].mxu0 %vm408_vm1, %v171_v52  ;;  %635 = vmatmul.mubr.msk.f32.gmra.mrb[4].mxu1 %vm408_vm1, %v174_v53 }
 0x185   : > { %v499_v54 = vpop.f32.mrb[0].mxu0  ;;  %v517_v55 = vpop.f32.mrb[0].mxu1 }
 0x186   : > { %534 = vst [vmem:[%s163_s6] sm:$0xff] %v499_v54  ;;  %540 = vst [vmem:[%s163_s6 + $0x30] sm:$0xff] %v517_v55  ;;  %v501_v2 = vpop.f32.mrb[1].mxu0  ;;  %v519_v56 = vpop.f32.mrb[1].mxu1 }
 0x187   : > { %535 = vst [vmem:[%s163_s6 + $0x8] sm:$0xff] %v501_v2  ;;  %541 = vst [vmem:[%s163_s6 + $0x38] sm:$0xff] %v519_v56 }
 0x189   : > { %v505_v57 = vpop.f32.mrb[2].mxu0  ;;  %v523_v58 = vpop.f32.mrb[2].mxu1 }
 0x18a   : > { %536 = vst [vmem:[%s163_s6 + $0x10] sm:$0xff] %v505_v57  ;;  %542 = vst [vmem:[%s163_s6 + $0x40] sm:$0xff] %v523_v58  ;;  %v507_v59 = vpop.f32.mrb[3].mxu0  ;;  %v525_v60 = vpop.f32.mrb[3].mxu1 }
 0x18b   : > { %537 = vst [vmem:[%s163_s6 + $0x18] sm:$0xff] %v507_v59  ;;  %543 = vst [vmem:[%s163_s6 + $0x48] sm:$0xff] %v525_v60 }
 0x18d   : > { %v511_v61 = vpop.f32.mrb[4].mxu0  ;;  %v529_v62 = vpop.f32.mrb[4].mxu1 }
 0x18e   : > { %538 = vst [vmem:[%s163_s6 + $0x20] sm:$0xff] %v511_v61  ;;  %544 = vst [vmem:[%s163_s6 + $0x50] sm:$0xff] %v529_v62  ;;  %v513_v63 = vpop.f32.mrb[5].mxu0  ;;  %v531_v1 = vpop.f32.mrb[5].mxu1 }
 0x18f   : > { %539 = vst [vmem:[%s163_s6 + $0x28] sm:$0xff] %v513_v63  ;;  %545 = vst [vmem:[%s163_s6 + $0x58] sm:$0xff] %v531_v1 }
 0x190   : > { %721 = shalt.err (!%p718_p3)
}
 0x191   : > { %s722_s25 = scalar_lea.hbm %s1006_s11, 1536  ;;  %s726_s28 = scalar_lea.hbm %s1057_s3, 3072 }
 0x192   : > { %p723_p4 = scmp.ne.s32.totalorder %s1006_s11, %s722_s25  ;;  %p727_p9 = scmp.lt.u32.totalorder %s1006_s11, %s1057_s3 }
 0x193   : > { %p728_p10 = scmp.lt.u32.totalorder %s726_s28, %s722_s25  ;;  %p730_p12 = scmp.lt.u32.totalorder %s722_s25, %s1006_s11 }
 0x194   : > { %p724_p7 = pnand %p723_p4, %p842_p5 }
 0x195   : > { %p729_p11 = por %p728_p10, %p727_p9 }
 0x196   : > { %p725_p8 = pneg %p724_p7 }
 0x197   : > { %p731_p13 = por %p730_p12, %p729_p11 }
 0x199   : > { %p732_p0 = pnand %p731_p13, %p725_p8 }
 0x19b   : > { %735 = shalt.err (!%p732_p0)
}
 0x19c   : > { %s783_s5 = smov 256  }
 0x19d   : > { %656 = dma.vmem_to_hbm [thread:$0]  (%p842_p5), %s1008_s8, 1536, %s1006_s11, %s1012_s16, %s783_s5, %s783_s5, %s774_s4  }
 0x19e PF: > { %p662_p1 = scmp.ge.s32.totalorder %s770_s15, 2  ;;  %s575_s6 = sand.u32 1, %s758_s12  }
 0x19f   : > { %s576_s7 = scalar_lea.sflag [#allocation3], %s575_s6 }
 0x1a0   : > { %p659_p2 = pnand %p662_p1, %p846_p6 }
 0x1a2   : > { %753 = dma.done.wait (!%p659_p2), %s576_s7, 1536  }
 0x1a3   : > { %755 = vsyncadd (!%p659_p2), %s576_s7, 4294965760  ;;  %p13_p3 = scmp.ge.s32.totalorder %s829_s18, 4   ;;  %s1060_s12 = smov %s762_s13 }
 0x1a4   : > { %s1061_s13 = smov %s766_s14  ;;  %s1062_s14 = smov %s840_s21 }
 0x1a5   : > { %s1063_s15 = smov %s829_s18  ;;  %15 = sbr.rel (!%p13_p3) target bundleno = 3 (0x3), region = 67 }
 0x1ac   :  { %581 = vsyncpa [#allocation3], 1 }
 0x1ad   :  { %583 = vsyncpa [#allocation3 + $0x1], 1 }

</bundles_post_ra>
